<compile_context>
chip_gen: v7x
topology: tpu7x:2x2x1
jax: 0.10.0
libtpu: 0.0.40
codegen_flags: <defaults>
</compile_context>

<pallas_src>
import functools

import jax
import jax.numpy as jnp
from jax.experimental import pallas as pl
from jax.experimental.pallas import tpu as pltpu

_LANE = 128
_SUB_BF16 = 16


def _round_up(n, m):
    return ((n + m - 1) // m) * m


def _mlp_kernel(x_ref, w1_ref, b1_ref, w2_ref, b2_ref, w3_ref, b3_ref, o_ref):
    # bf16 operands into the MXU, f32 accumulation, f32 bias/ReLU epilogue.
    x = x_ref[...]  # already bf16 (cast fused into the wrapper pad)

    h1 = jnp.dot(x, w1_ref[...], preferred_element_type=jnp.float32) + b1_ref[...]
    h1 = jnp.maximum(h1, 0.0).astype(jnp.bfloat16)

    h2 = jnp.dot(h1, w2_ref[...], preferred_element_type=jnp.float32) + b2_ref[...]
    h2 = jnp.maximum(h2, 0.0).astype(jnp.bfloat16)

    out = jnp.dot(h2, w3_ref[...], preferred_element_type=jnp.float32) + b3_ref[...]
    o_ref[...] = out.astype(o_ref.dtype)


def prepare_params(params):
    """One-time glue, hoisted out of the forward path.

    Transposes PyTorch (out, in) weights to (in, out), pads the input-feature
    dim only to a multiple of 16 (bf16 sublanes) and the hidden dim to a
    multiple of 128 lanes, casts weights to bf16 and biases to f32 (1, Hp).
    Returns (w1t, b1, w2t, b2, w3t, b3, hidden_size).
    """
    H, I = params["w1"].shape
    Ip = _round_up(I, _SUB_BF16)     # no K-pad to 128: avoid 4x zero MAC/DMA
    Hp = _round_up(H, _LANE)         # lane-dense N for unmasked vst

    def pad2(a, rows, cols):
        return jnp.pad(a, ((0, rows - a.shape[0]), (0, cols - a.shape[1])))

    w1t = pad2(params["w1"].T.astype(jnp.bfloat16), Ip, Hp)
    w2t = pad2(params["w2"].T.astype(jnp.bfloat16), Hp, Hp)
    w3t = pad2(params["w3"].T.astype(jnp.bfloat16), Hp, Hp)

    def padb(b):
        return jnp.pad(b.astype(jnp.float32), (0, Hp - H)).reshape(1, Hp)

    return (w1t, padb(params["b1"]), w2t, padb(params["b2"]),
            w3t, padb(params["b3"]), H)


def _pick_bb(B, block_b, min_grid):
    """Largest multiple-of-16 batch tile <= block_b that still gives at least
    `min_grid` grid steps (>= 2 per TensorCore on 2-TC parts) when B allows."""
    bb = min(block_b, B)
    bb = (bb // _SUB_BF16) * _SUB_BF16
    if bb <= 0:
        return B                                  # tiny batch: one full block
    while bb > _SUB_BF16 and -(-B // bb) < min_grid:
        bb = max(_SUB_BF16, ((bb // 2) // _SUB_BF16) * _SUB_BF16)
    return bb


def _vmem_cap_bytes():
    """Generation-aware cap: ~80% of per-core VMEM (≈51 MiB v7x, ≈102 MiB
    v5e/v6e); conservative 48 MiB fallback if the query is unavailable."""
    try:
        cap = getattr(pltpu.get_tpu_info(), "vmem_capacity_bytes", None)
        if cap:
            return int(cap * 0.8)
    except Exception:
        pass
    return 48 << 20


@functools.partial(jax.jit, static_argnames=("out_dim", "block_b", "min_grid"))
def mlp_forward(x, w1t, b1, w2t, b2, w3t, b3, *, out_dim, block_b=256,
                min_grid=4):
    """Fused MLP forward.  x: (B, input_size) f32; prepared params from
    prepare_params(); out_dim = hidden_size (valid output columns)."""
    B, I = x.shape
    Ip, Hp = w1t.shape

    # Fuse the bf16 cast with the (optional) feature pad: halves x DMA bytes.
    if I != Ip:
        x = jnp.pad(x.astype(jnp.bfloat16), ((0, 0), (0, Ip - I)))
    else:
        x = x.astype(jnp.bfloat16)

    bb = _pick_bb(B, block_b, min_grid)
    grid = (pl.cdiv(B, bb),)

    # VMEM footprint: single-buffered weights/biases (Buffered(1)),
    # double-buffered x/out tiles, f32 intermediates; 1.5x headroom.
    w_bytes = (w1t.size + w2t.size + w3t.size) * 2            # bf16, 1 buffer
    b_bytes = (b1.size + b2.size + b3.size) * 4               # f32, 1 buffer
    x_bytes = 2 * bb * Ip * 2                                 # bf16, 2 buffers
    o_bytes = 2 * bb * Hp * 4                                 # f32, 2 buffers
    inter_bytes = 3 * bb * Hp * 4                             # h1/h2/out live
    need = w_bytes + b_bytes + x_bytes + o_bytes + inter_bytes
    cap = _vmem_cap_bytes()
    vmem_limit = int(min(max(int(need * 1.5), 32 << 20), cap))
    if vmem_limit < need:
        # Footprint exceeds the safe cap: request it anyway rather than fail
        # silently.  TODO(synk): switch to the K/N-split reduction path here.
        vmem_limit = int(need)

    const = lambda i: (0, 0)   # weights/biases: DMA once, stay VMEM-resident
    once = pl.Buffered(1)      # single-buffer the constant operands

    out = pl.pallas_call(
        _mlp_kernel,
        out_shape=jax.ShapeDtypeStruct((B, Hp), jnp.float32),
        grid_spec=pltpu.PrefetchScalarGridSpec(
            num_scalar_prefetch=0,
            grid=grid,
            in_specs=[
                pl.BlockSpec((bb, Ip), lambda i: (i, 0)),                   # x
                pl.BlockSpec((Ip, Hp), const, pipeline_mode=once),          # w1^T
                pl.BlockSpec((1, Hp), const, pipeline_mode=once),           # b1
                pl.BlockSpec((Hp, Hp), const, pipeline_mode=once),          # w2^T
                pl.BlockSpec((1, Hp), const, pipeline_mode=once),           # b2
                pl.BlockSpec((Hp, Hp), const, pipeline_mode=once),          # w3^T
                pl.BlockSpec((1, Hp), const, pipeline_mode=once),           # b3
            ],
            out_specs=pl.BlockSpec((bb, Hp), lambda i: (i, 0)),
        ),
        compiler_params=pltpu.CompilerParams(
            dimension_semantics=("parallel",),
            vmem_limit_bytes=vmem_limit,
        ),
    )(x, w1t, b1, w2t, b2, w3t, b3)

    # NOTE: when out_dim << Hp this slice is an extra XLA copy; emit bf16 /
    # unpadded output instead if the consumer tolerates it.
    return out[:, :out_dim]


def init_mlp_params(key, input_size, hidden_size):
    """Deterministic PyTorch-nn.Linear-style uniform init (stored (out, in))."""
    ks = jax.random.split(key, 6)

    def linear_init(kw, kb, fan_in, fan_out):
        bound = 1.0 / jnp.sqrt(fan_in)
        w = jax.random.uniform(kw, (fan_out, fan_in), jnp.float32, -bound, bound)
        b = jax.random.uniform(kb, (fan_out,), jnp.float32, -bound, bound)
        return w, b

    w1, b1 = linear_init(ks[0], ks[1], input_size, hidden_size)
    w2, b2 = linear_init(ks[2], ks[3], hidden_size, hidden_size)
    w3, b3 = linear_init(ks[4], ks[5], hidden_size, hidden_size)
    return {"w1": w1, "b1": b1, "w2": w2, "b2": b2, "w3": w3, "b3": b3}


def mlp_reference_f32(x, p):
    h = jnp.maximum(x @ p["w1"].T + p["b1"], 0.0)
    h = jnp.maximum(h @ p["w2"].T + p["b2"], 0.0)
    return h @ p["w3"].T + p["b3"]


def mlp_reference_bf16(x, p):
    """Matched-precision reference: bf16 matmul operands, f32 accumulation."""
    def dot(a, w):
        return jnp.dot(a.astype(jnp.bfloat16), w.T.astype(jnp.bfloat16),
                       preferred_element_type=jnp.float32)
    h = jnp.maximum(dot(x, p["w1"]) + p["b1"], 0.0)
    h = jnp.maximum(dot(h, p["w2"]) + p["b2"], 0.0)
    return dot(h, p["w3"]) + p["b3"]


if __name__ == "__main__":
    key = jax.random.PRNGKey(0)
    k_x, k_p = jax.random.split(key)

    batch = 512          # with block_b=256 the picker uses bb=128 -> 4 steps
    input_size = 32
    hidden_size = 32

    x = jax.random.normal(k_x, (batch, input_size), jnp.float32)
    params = init_mlp_params(k_p, input_size, hidden_size)

    # One-time prep (transpose / pad / bf16 cast), not per call.
    w1t, b1, w2t, b2, w3t, b3, hidden = prepare_params(params)

    out = mlp_forward(x, w1t, b1, w2t, b2, w3t, b3, out_dim=hidden)
    out = jax.block_until_ready(out)
    assert out.shape == (batch, hidden_size)

    # Matched-precision check (same bf16-operand / f32-accumulate math).
    ref = mlp_reference_bf16(x, params)
    assert jnp.allclose(out, ref, atol=2e-3, rtol=2e-3), "mismatch vs bf16 reference"

    # Loose sanity check against the full-f32 PyTorch-equivalent forward.
    max_err = float(jnp.max(jnp.abs(out - mlp_reference_f32(x, params))))
    assert max_err < 0.1, f"bf16 drift too large vs f32 reference: {max_err}"

    print("KERNEL_OK")
</pallas_src>

<mosaic_0001>
module attributes {stable_mosaic.version = 11 : i64} {
  func.func @_mlp_kernel(%arg0: i32, %arg1: memref<128x32xbf16, #tpu.memory_space<vmem>>, %arg2: memref<32x128xbf16, #tpu.memory_space<vmem>>, %arg3: memref<1x128xf32, #tpu.memory_space<vmem>>, %arg4: memref<128x128xbf16, #tpu.memory_space<vmem>>, %arg5: memref<1x128xf32, #tpu.memory_space<vmem>>, %arg6: memref<128x128xbf16, #tpu.memory_space<vmem>>, %arg7: memref<1x128xf32, #tpu.memory_space<vmem>>, %arg8: memref<128x128xf32, #tpu.memory_space<vmem>>) attributes {dimension_semantics = [#tpu.dimension_semantics<parallel>], iteration_bounds = array<i64: 4>, scalar_prefetch = 0 : i64, scratch_operands = 0 : i64, tpu.core_type = #tpu.core_type<tc>, window_params = [{transform_indices = @transform_0, window_bounds = array<i64: 128, 32>}, {pipeline_mode = #tpu.pipeline_mode<synchronous>, transform_indices = @transform_1, window_bounds = array<i64: 32, 128>}, {pipeline_mode = #tpu.pipeline_mode<synchronous>, transform_indices = @transform_2, window_bounds = array<i64: 1, 128>}, {pipeline_mode = #tpu.pipeline_mode<synchronous>, transform_indices = @transform_3, window_bounds = array<i64: 128, 128>}, {pipeline_mode = #tpu.pipeline_mode<synchronous>, transform_indices = @transform_4, window_bounds = array<i64: 1, 128>}, {pipeline_mode = #tpu.pipeline_mode<synchronous>, transform_indices = @transform_5, window_bounds = array<i64: 128, 128>}, {pipeline_mode = #tpu.pipeline_mode<synchronous>, transform_indices = @transform_6, window_bounds = array<i64: 1, 128>}, {transform_indices = @transform_7, window_bounds = array<i64: 128, 128>}]} {
    %c0 = arith.constant 0 : index
    %c0_0 = arith.constant 0 : index
    %0 = vector.load %arg1[%c0, %c0_0] : memref<128x32xbf16, #tpu.memory_space<vmem>>, vector<128x32xbf16>
    %c0_1 = arith.constant 0 : index
    %c0_2 = arith.constant 0 : index
    %1 = vector.load %arg2[%c0_1, %c0_2] : memref<32x128xbf16, #tpu.memory_space<vmem>>, vector<32x128xbf16>
    %cst = arith.constant dense<0.000000e+00> : vector<128x128xf32>
    %2 = tpu.matmul %0, %1, %cst {dimension_numbers = #tpu.dot_dimension_numbers<[1], [0], [0], [1], [0, 0, 1, 1], [], []>} : vector<128x32xbf16>, vector<32x128xbf16>, vector<128x128xf32> -> vector<128x128xf32>
    %c0_3 = arith.constant 0 : index
    %c0_4 = arith.constant 0 : index
    %3 = vector.load %arg3[%c0_3, %c0_4] : memref<1x128xf32, #tpu.memory_space<vmem>>, vector<1x128xf32>
    %4 = vector.broadcast %3 : vector<1x128xf32> to vector<128x128xf32>
    %5 = arith.addf %2, %4 : vector<128x128xf32>
    %cst_5 = arith.constant 0.000000e+00 : f32
    %6 = vector.broadcast %cst_5 : f32 to vector<128x128xf32>
    %7 = arith.maximumf %5, %6 : vector<128x128xf32>
    %8 = arith.truncf %7 : vector<128x128xf32> to vector<128x128xbf16>
    %c0_6 = arith.constant 0 : index
    %c0_7 = arith.constant 0 : index
    %9 = vector.load %arg4[%c0_6, %c0_7] : memref<128x128xbf16, #tpu.memory_space<vmem>>, vector<128x128xbf16>
    %cst_8 = arith.constant dense<0.000000e+00> : vector<128x128xf32>
    %10 = tpu.matmul %8, %9, %cst_8 {dimension_numbers = #tpu.dot_dimension_numbers<[1], [0], [0], [1], [0, 0, 1, 1], [], []>} : vector<128x128xbf16>, vector<128x128xbf16>, vector<128x128xf32> -> vector<128x128xf32>
    %c0_9 = arith.constant 0 : index
    %c0_10 = arith.constant 0 : index
    %11 = vector.load %arg5[%c0_9, %c0_10] : memref<1x128xf32, #tpu.memory_space<vmem>>, vector<1x128xf32>
    %12 = vector.broadcast %11 : vector<1x128xf32> to vector<128x128xf32>
    %13 = arith.addf %10, %12 : vector<128x128xf32>
    %cst_11 = arith.constant 0.000000e+00 : f32
    %14 = vector.broadcast %cst_11 : f32 to vector<128x128xf32>
    %15 = arith.maximumf %13, %14 : vector<128x128xf32>
    %16 = arith.truncf %15 : vector<128x128xf32> to vector<128x128xbf16>
    %c0_12 = arith.constant 0 : index
    %c0_13 = arith.constant 0 : index
    %17 = vector.load %arg6[%c0_12, %c0_13] : memref<128x128xbf16, #tpu.memory_space<vmem>>, vector<128x128xbf16>
    %cst_14 = arith.constant dense<0.000000e+00> : vector<128x128xf32>
    %18 = tpu.matmul %16, %17, %cst_14 {dimension_numbers = #tpu.dot_dimension_numbers<[1], [0], [0], [1], [0, 0, 1, 1], [], []>} : vector<128x128xbf16>, vector<128x128xbf16>, vector<128x128xf32> -> vector<128x128xf32>
    %c0_15 = arith.constant 0 : index
    %c0_16 = arith.constant 0 : index
    %19 = vector.load %arg7[%c0_15, %c0_16] : memref<1x128xf32, #tpu.memory_space<vmem>>, vector<1x128xf32>
    %20 = vector.broadcast %19 : vector<1x128xf32> to vector<128x128xf32>
    %21 = arith.addf %18, %20 : vector<128x128xf32>
    %c0_17 = arith.constant 0 : index
    %c0_18 = arith.constant 0 : index
    %22 = vector.load %arg8[%c0_17, %c0_18] : memref<128x128xf32, #tpu.memory_space<vmem>>, vector<128x128xf32>
    tpu.vector_store %arg8[%c0_17, %c0_18], %21 {strides = array<i32>} : memref<128x128xf32, #tpu.memory_space<vmem>>, vector<128x128xf32>,
    return
  }
  func.func @transform_0(%arg0: i32) -> (i32, i32) {
    %c0_i32 = arith.constant 0 : i32
    %c0_i32_0 = arith.constant 0 : i32
    return %arg0, %c0_i32 : i32, i32
  }
  func.func @transform_1(%arg0: i32) -> (i32, i32) {
    %c0_i32 = arith.constant 0 : i32
    %c0_i32_0 = arith.constant 0 : i32
    %c0_i32_1 = arith.constant 0 : i32
    return %c0_i32, %c0_i32_0 : i32, i32
  }
  func.func @transform_2(%arg0: i32) -> (i32, i32) {
    %c0_i32 = arith.constant 0 : i32
    %c0_i32_0 = arith.constant 0 : i32
    %c0_i32_1 = arith.constant 0 : i32
    return %c0_i32, %c0_i32_0 : i32, i32
  }
  func.func @transform_3(%arg0: i32) -> (i32, i32) {
    %c0_i32 = arith.constant 0 : i32
    %c0_i32_0 = arith.constant 0 : i32
    %c0_i32_1 = arith.constant 0 : i32
    return %c0_i32, %c0_i32_0 : i32, i32
  }
  func.func @transform_4(%arg0: i32) -> (i32, i32) {
    %c0_i32 = arith.constant 0 : i32
    %c0_i32_0 = arith.constant 0 : i32
    %c0_i32_1 = arith.constant 0 : i32
    return %c0_i32, %c0_i32_0 : i32, i32
  }
  func.func @transform_5(%arg0: i32) -> (i32, i32) {
    %c0_i32 = arith.constant 0 : i32
    %c0_i32_0 = arith.constant 0 : i32
    %c0_i32_1 = arith.constant 0 : i32
    return %c0_i32, %c0_i32_0 : i32, i32
  }
  func.func @transform_6(%arg0: i32) -> (i32, i32) {
    %c0_i32 = arith.constant 0 : i32
    %c0_i32_0 = arith.constant 0 : i32
    %c0_i32_1 = arith.constant 0 : i32
    return %c0_i32, %c0_i32_0 : i32, i32
  }
  func.func @transform_7(%arg0: i32) -> (i32, i32) {
    %c0_i32 = arith.constant 0 : i32
    %c0_i32_0 = arith.constant 0 : i32
    return %arg0, %c0_i32 : i32, i32
  }
}

</mosaic_0001>

<bundles_post_ra>
// kernel: mlp_forward.1
= control target key start
LH: loop header
LB: loop body
LE: loop exit
PB: predicated region body
PF: predicated region fallthrough
CT: control target
= control target key end

     0   :  { %s1196_s24 = smov 0   ;;  %s1316_s0 = inlined_call_operand.vmem [shape: bf16[512,32], index: 0, kind: input, shape index: {}]   ;;  %s1317_s1 = inlined_call_operand.vmem [shape: bf16[32,128], index: 1, kind: input, shape index: {}]   ;;  %s1318_s2 = inlined_call_operand.vmem [shape: f32[1,128], index: 2, kind: input, shape index: {}]   ;;  %s1319_s3 = inlined_call_operand.vmem [shape: bf16[128,128], index: 3, kind: input, shape index: {}]   ;;  %s1320_s4 = inlined_call_operand.vmem [shape: f32[1,128], index: 4, kind: input, shape index: {}]   ;;  %s1321_s5 = inlined_call_operand.vmem [shape: bf16[128,128], index: 5, kind: input, shape index: {}]   ;;  %s1322_s6 = inlined_call_operand.vmem [shape: f32[1,128], index: 6, kind: input, shape index: {}]   ;;  %s1323_s7 = inlined_call_operand.vmem [shape: f32[512,128], index: 7, kind: output, shape index: {}]  }
   0x1 LB: > { %s940_s25 = sadd.s32 4294967295, %s1154_s24   ;;  %p944_p0 = scmp.ge.s32.totalorder %s1154_s24, 1  ;;  %s1154_s24 = sphi %s1196_s24, %s17_s24  }
   0x2   : > { %p238_p1 = scmp.lt.s32.totalorder %s1154_s24, 5 }
   0x4   : > { %p239_p2 = pnand %p944_p0, %p238_p1 }
   0x5   : > { %v1122_v0 = vld [vmem:[%s1317_s1] sm:$0xff] (!%p239_p2)   ;;  %s945_s28 = sshll.u32 (!%p239_p2), %s940_s25, 4  ;;  %v1123_v1 = vld [vmem:[%s1317_s1 + $0x8] sm:$0xff] (!%p239_p2)   ;;  %vm362_vm0 = vcmask (!%p239_p2), 261120   ;;  %v1134_v4 = vld [vmem:[%s1319_s3 + $0x10] sm:$0xff] (!%p239_p2)  }
   0x6   : > { %242 = sbr.rel (%p239_p2) target bundleno = 704 (0x2c0), region = 48  ;;  %p271_p3 = scmp.lt.s32.totalorder (!%p239_p2), %s945_s28, 63  ;;  %1030 = vmatprep.subr.bf16.mxu0 (!%p239_p2), %v1122_v0  ;;  %v1132_v2 = vld [vmem:[%s1319_s3] sm:$0xff] (!%p239_p2)   ;;  %v1133_v3 = vld [vmem:[%s1319_s3 + $0x8] sm:$0xff] (!%p239_p2)   ;;  %v1135_v8 = vld [vmem:[%s1319_s3 + $0x18] sm:$0xff] (!%p239_p2)  }
   0x7   : > { %1031 = vmatpush3.bf16.msra.mxu0 (!%p239_p2), %v1122_v0  ;;  %1050 = vmatprep.subr.bf16.mxu1 (!%p239_p2), %v1132_v2  ;;  %v1136_v9 = vld [vmem:[%s1319_s3 + $0x20] sm:$0xff] (!%p239_p2)   ;;  %v1137_v12 = vld [vmem:[%s1319_s3 + $0x28] sm:$0xff] (!%p239_p2)   ;;  %v1138_v16 = vld [vmem:[%s1319_s3 + $0x30] sm:$0xff] (!%p239_p2)  }
   0x8   : > { %1032 = vmatprep.subr.bf16.mxu0 (!%p239_p2), %v1123_v1  ;;  %1051 = vmatpush3.bf16.msra.mxu1 (!%p239_p2), %v1132_v2  ;;  %v1139_v17 = vld [vmem:[%s1319_s3 + $0x38] sm:$0xff] (!%p239_p2)   ;;  %v1140_v18 = vld [vmem:[%s1321_s5] sm:$0xff] (!%p239_p2)   ;;  %v1141_v19 = vld [vmem:[%s1321_s5 + $0x8] sm:$0xff] (!%p239_p2)  }
   0x9   : > { %1052 = vmatprep.subr.bf16.mxu1 (!%p239_p2), %v1133_v3  ;;  %v1142_v20 = vld [vmem:[%s1321_s5 + $0x10] sm:$0xff] (!%p239_p2)   ;;  %v1143_v21 = vld [vmem:[%s1321_s5 + $0x18] sm:$0xff] (!%p239_p2)   ;;  %v1144_v22 = vld [vmem:[%s1321_s5 + $0x20] sm:$0xff] (!%p239_p2)  }
   0xa   : > { %v1145_v23 = vld [vmem:[%s1321_s5 + $0x28] sm:$0xff] (!%p239_p2)   ;;  %v949_v24 = vld [vmem:[%s1318_s2] ss:$0 sm:$0xff] (!%p239_p2) }
   0xb   : > { %1033 = vmatpush3.bf16.msra.mxu0 (!%p239_p2), %v1123_v1 }
   0xc   : > { %1053 = vmatpush3.bf16.msra.mxu1 (!%p239_p2), %v1133_v3  ;;  %1082 = vmatprep.subr.bf16.mxu0 (!%p239_p2), %v1140_v18 }
   0xd   : > { %s1325_s28 = smov (!%p271_p3, %s945_s28), 63  ;;  %1054 = vmatprep.subr.bf16.mxu1 %v1134_v4 }
   0xe   : > { %s946_s12 = sshll.u32 %s1325_s28, 2  ;;  %s948_s29 = sshll.u32 %s1325_s28, 3 }
   0xf   : > { %s1222_s15 = scalar_lea.vmem %s1316_s0, %s946_s12  ;;  %s1295_s11 = scalar_lea.vmem %s1323_s7, %s948_s29 }
  0x10   : > { %v1124_v5 = vld [vmem:[%s1222_s15] sm:$0xff]   ;;  %v1125_v6 = vld [vmem:[%s1222_s15 + $0x8] sm:$0xff]   ;;  %v1126_v7 = vld [vmem:[%s1222_s15 + $0x10] sm:$0xff]   ;;  %1055 = vmatpush3.bf16.msra.mxu1 %v1134_v4 }
  0x11   : > { %1034 = vmatprep.mubr.msk.bf16.mxu0 %vm362_vm0, %v1124_v5  ;;  %v1127_v10 = vld [vmem:[%s1222_s15 + $0x18] sm:$0xff]   ;;  %1056 = vmatprep.subr.bf16.mxu1 %v1135_v8  ;;  %v1128_v11 = vld [vmem:[%s1222_s15 + $0x20] sm:$0xff]   ;;  %v1129_v13 = vld [vmem:[%s1222_s15 + $0x28] sm:$0xff]  }
  0x12   : > { %1035 = vmatmul.mubr.msk.bf16.vlgmr.msra.gmra.mrb[0].mxu0 %vm362_vm0, %v1125_v6  ;;  %v1130_v14 = vld [vmem:[%s1222_s15 + $0x30] sm:$0xff]   ;;  %v1131_v15 = vld [vmem:[%s1222_s15 + $0x38] sm:$0xff]  }
  0x13   : > { %1038 = vmatprep.mubr.msk.bf16.mxu0 %vm362_vm0, %v1126_v7  ;;  %1083 = vmatpush3.bf16.msra.mxu0 %v1140_v18  ;;  %v1147_v18 = vld [vmem:[%s1321_s5 + $0x38] sm:$0xff]  }
  0x14   : > { %1057 = vmatpush3.bf16.msra.mxu1 %v1135_v8  ;;  %1084 = vmatprep.subr.bf16.mxu0 %v1141_v19 }
  0x15   : > { %1058 = vmatprep.subr.bf16.mxu1 %v1136_v9 }
  0x17   : > { %1085 = vmatpush3.bf16.msra.mxu0 %v1141_v19  ;;  %v968_v19 = vld [vmem:[%s1320_s4] ss:$0 sm:$0xff] }
  0x18   : > { %1059 = vmatpush3.bf16.msra.mxu1 %v1136_v9  ;;  %1086 = vmatprep.subr.bf16.mxu0 %v1142_v20 }
  0x19   : > { %1060 = vmatprep.subr.bf16.mxu1 %v1137_v12 }
  0x1a   : > { %1039 = vmatmul.mubr.msk.bf16.gmra.mrb[4].mxu0 %vm362_vm0, %v1127_v10 }
  0x1b   : > { %1042 = vmatprep.mubr.msk.bf16.mxu0 %vm362_vm0, %v1128_v11  ;;  %1087 = vmatpush3.bf16.msra.mxu0 %v1142_v20 }
  0x1c   : > { %1061 = vmatpush3.bf16.msra.mxu1 %v1137_v12  ;;  %1088 = vmatprep.subr.bf16.mxu0 %v1143_v21 }
  0x1d   : > { %1062 = vmatprep.subr.bf16.mxu1 %v1138_v16 }
  0x1f   : > { %1089 = vmatpush3.bf16.msra.mxu0 %v1143_v21 }
  0x20   : > { %1063 = vmatpush3.bf16.msra.mxu1 %v1138_v16  ;;  %1090 = vmatprep.subr.bf16.mxu0 %v1144_v22 }
  0x21   : > { %1064 = vmatprep.subr.bf16.mxu1 %v1139_v17 }
  0x22   : > { %1043 = vmatmul.mubr.msk.bf16.gmra.mrb[8].mxu0 %vm362_vm0, %v1129_v13 }
  0x23   : > { %1046 = vmatprep.mubr.msk.bf16.mxu0 %vm362_vm0, %v1130_v14  ;;  %1091 = vmatpush3.bf16.msra.mxu0 %v1144_v22 }
  0x24   : > { %1065 = vmatpush3.bf16.msra.mxu1 %v1139_v17  ;;  %1092 = vmatprep.subr.bf16.mxu0 %v1145_v23  ;;  %v1146_v17 = vld [vmem:[%s1321_s5 + $0x30] sm:$0xff]  }
  0x27   : > { %1093 = vmatpush3.bf16.msra.mxu0 %v1145_v23 }
  0x28   : > { %1094 = vmatprep.subr.bf16.mxu0 %v1146_v17 }
  0x2a   : > { %1047 = vmatmul.mubr.msk.bf16.gmra.mrb[12].mxu0 %vm362_vm0, %v1131_v15 }
  0x2b   : > { %1095 = vmatpush3.bf16.msra.mxu0 %v1146_v17 }
  0x2c   : > { %1096 = vmatprep.subr.bf16.mxu0 %v1147_v18 }
  0x2f   : > { %1097 = vmatpush3.bf16.msra.mxu0 %v1147_v18 }
  0xe5   : > { %v1036_v25 = vpop.f32.mrb[0].mxu0 }
  0xe6   : > { %v430_v26 = vadd.f32 %v1036_v25, %v949_v24  ;;  %v421_v27 = vpop.f32.mrb[1].mxu0 }
  0xe7   : > { %v422_v28 = vadd.f32 %v949_v24, %v421_v27  ;;  %v1037_v29 = vpop.f32.mrb[2].mxu0 }
  0xe8   : > { %v433_v30 = vadd.f32 %v1037_v29, %v949_v24  ;;  %v424_v31 = vpop.f32.mrb[3].mxu0  ;;  %v486_v33 = vmax.f32 %v430_v26, 0.0 }
  0xe9   : > { %v425_v32 = vadd.f32 %v949_v24, %v424_v31  ;;  %v484_v35 = vmax.f32 %v422_v28, 0.0 }
  0xea   : > { %v487_v34 = vmax.f32 %v433_v30, 0.0 }
  0xeb   : > { %v485_v36 = vmax.f32 %v425_v32, 0.0 }
  0xec   : > { %v501_v37 = vpack.c.bf16 %v487_v34, %v486_v33 }
  0xed   : > { %v1040_v38 = vpop.f32.mrb[4].mxu0  ;;  %v500_v39 = vpack.c.bf16 %v485_v36, %v484_v35 }
  0xee   : > { %v446_v40 = vadd.f32 %v1040_v38, %v949_v24  ;;  %v437_v41 = vpop.f32.mrb[5].mxu0 }
  0xef   : > { %v438_v42 = vadd.f32 %v949_v24, %v437_v41  ;;  %v1041_v43 = vpop.f32.mrb[6].mxu0  ;;  %1066 = vmatprep.mubr.bf16.mxu1 %v500_v39 }
  0xf0   : > { %v449_v44 = vadd.f32 %v1041_v43, %v949_v24  ;;  %v440_v45 = vpop.f32.mrb[7].mxu0  ;;  %1067 = vmatmul.mubr.bf16.vlgmr.msra.gmra.mrb[0].mxu1 %v501_v37  ;;  %v490_v47 = vmax.f32 %v446_v40, 0.0 }
  0xf1   : > { %v441_v46 = vadd.f32 %v949_v24, %v440_v45  ;;  %v488_v49 = vmax.f32 %v438_v42, 0.0 }
  0xf2   : > { %v491_v48 = vmax.f32 %v449_v44, 0.0 }
  0xf3   : > { %v489_v50 = vmax.f32 %v441_v46, 0.0 }
  0xf4   : > { %v503_v51 = vpack.c.bf16 %v491_v48, %v490_v47 }
  0xf5   : > { %v502_v52 = vpack.c.bf16 %v489_v50, %v488_v49  ;;  %v1044_v53 = vpop.f32.mrb[8].mxu0 }
  0xf6   : > { %v462_v54 = vadd.f32 %v1044_v53, %v949_v24  ;;  %v453_v55 = vpop.f32.mrb[9].mxu0 }
  0xf7   : > { %v454_v56 = vadd.f32 %v949_v24, %v453_v55  ;;  %v1045_v57 = vpop.f32.mrb[10].mxu0  ;;  %1070 = vmatprep.mubr.bf16.mxu1 %v502_v52 }
  0xf8   : > { %v465_v58 = vadd.f32 %v1045_v57, %v949_v24  ;;  %v456_v59 = vpop.f32.mrb[11].mxu0  ;;  %1071 = vmatmul.mubr.bf16.gmra.mrb[4].mxu1 %v503_v51  ;;  %v494_v61 = vmax.f32 %v462_v54, 0.0 }
  0xf9   : > { %v457_v60 = vadd.f32 %v949_v24, %v456_v59  ;;  %v492_v63 = vmax.f32 %v454_v56, 0.0 }
  0xfa   : > { %v495_v62 = vmax.f32 %v465_v58, 0.0 }
  0xfb   : > { %v493_v0 = vmax.f32 %v457_v60, 0.0 }
  0xfc   : > { %v505_v1 = vpack.c.bf16 %v495_v62, %v494_v61 }
  0xfd   : > { %v504_v2 = vpack.c.bf16 %v493_v0, %v492_v63  ;;  %v1048_v3 = vpop.f32.mrb[12].mxu0 }
  0xfe   : > { %v478_v4 = vadd.f32 %v1048_v3, %v949_v24  ;;  %v469_v5 = vpop.f32.mrb[13].mxu0 }
  0xff   : > { %v470_v6 = vadd.f32 %v949_v24, %v469_v5  ;;  %v1049_v7 = vpop.f32.mrb[14].mxu0  ;;  %1074 = vmatprep.mubr.bf16.mxu1 %v504_v2 }
 0x100   : > { %v481_v8 = vadd.f32 %v1049_v7, %v949_v24  ;;  %v472_v9 = vpop.f32.mrb[15].mxu0  ;;  %1075 = vmatmul.mubr.bf16.gmra.mrb[8].mxu1 %v505_v1  ;;  %v498_v11 = vmax.f32 %v478_v4, 0.0 }
 0x101   : > { %v473_v10 = vadd.f32 %v949_v24, %v472_v9  ;;  %v496_v13 = vmax.f32 %v470_v6, 0.0 }
 0x102   : > { %v499_v12 = vmax.f32 %v481_v8, 0.0 }
 0x103   : > { %v497_v14 = vmax.f32 %v473_v10, 0.0 }
 0x104   : > { %v507_v15 = vpack.c.bf16 %v499_v12, %v498_v11  ;;  %v977_v12 = vld [vmem:[%s1322_s6] ss:$0 sm:$0xff] }
 0x105   : > { %v506_v16 = vpack.c.bf16 %v497_v14, %v496_v13 }
 0x107   : > { %1078 = vmatprep.mubr.bf16.mxu1 %v506_v16 }
 0x108   : > { %1079 = vmatmul.mubr.bf16.gmra.mrb[12].mxu1 %v507_v15 }
 0x1c3   : > { %v1068_v20 = vpop.f32.mrb[0].mxu1 }
 0x1c4   : > { %v622_v21 = vadd.f32 %v1068_v20, %v968_v19  ;;  %v613_v22 = vpop.f32.mrb[1].mxu1 }
 0x1c5   : > { %v614_v23 = vadd.f32 %v968_v19, %v613_v22  ;;  %v1069_v24 = vpop.f32.mrb[2].mxu1 }
 0x1c6   : > { %v625_v25 = vadd.f32 %v1069_v24, %v968_v19  ;;  %v616_v26 = vpop.f32.mrb[3].mxu1  ;;  %v678_v28 = vmax.f32 %v622_v21, 0.0 }
 0x1c7   : > { %v617_v27 = vadd.f32 %v968_v19, %v616_v26  ;;  %v676_v30 = vmax.f32 %v614_v23, 0.0 }
 0x1c8   : > { %v679_v29 = vmax.f32 %v625_v25, 0.0 }
 0x1c9   : > { %v677_v31 = vmax.f32 %v617_v27, 0.0 }
 0x1ca   : > { %v693_v32 = vpack.c.bf16 %v679_v29, %v678_v28 }
 0x1cb   : > { %v692_v33 = vpack.c.bf16 %v677_v31, %v676_v30  ;;  %v1072_v34 = vpop.f32.mrb[4].mxu1 }
 0x1cc   : > { %v638_v35 = vadd.f32 %v1072_v34, %v968_v19  ;;  %v629_v36 = vpop.f32.mrb[5].mxu1 }
 0x1cd   : > { %v630_v37 = vadd.f32 %v968_v19, %v629_v36  ;;  %v1073_v38 = vpop.f32.mrb[6].mxu1  ;;  %1098 = vmatprep.mubr.bf16.mxu0 %v692_v33 }
 0x1ce   : > { %v641_v39 = vadd.f32 %v1073_v38, %v968_v19  ;;  %v632_v40 = vpop.f32.mrb[7].mxu1  ;;  %1099 = vmatmul.mubr.bf16.vlgmr.msra.gmra.mrb[16].mxu0 %v693_v32  ;;  %v682_v42 = vmax.f32 %v638_v35, 0.0 }
 0x1cf   : > { %v633_v41 = vadd.f32 %v968_v19, %v632_v40  ;;  %v680_v44 = vmax.f32 %v630_v37, 0.0 }
 0x1d0   : > { %v683_v43 = vmax.f32 %v641_v39, 0.0 }
 0x1d1   : > { %v681_v45 = vmax.f32 %v633_v41, 0.0 }
 0x1d2   : > { %v695_v46 = vpack.c.bf16 %v683_v43, %v682_v42 }
 0x1d3   : > { %v694_v47 = vpack.c.bf16 %v681_v45, %v680_v44  ;;  %v1076_v48 = vpop.f32.mrb[8].mxu1 }
 0x1d4   : > { %v654_v49 = vadd.f32 %v1076_v48, %v968_v19  ;;  %v645_v50 = vpop.f32.mrb[9].mxu1 }
 0x1d5   : > { %v646_v51 = vadd.f32 %v968_v19, %v645_v50  ;;  %v1077_v52 = vpop.f32.mrb[10].mxu1  ;;  %1102 = vmatprep.mubr.bf16.mxu0 %v694_v47 }
 0x1d6   : > { %v657_v53 = vadd.f32 %v1077_v52, %v968_v19  ;;  %v648_v54 = vpop.f32.mrb[11].mxu1  ;;  %1103 = vmatmul.mubr.bf16.gmra.mrb[20].mxu0 %v695_v46  ;;  %v686_v56 = vmax.f32 %v654_v49, 0.0 }
 0x1d7   : > { %v649_v55 = vadd.f32 %v968_v19, %v648_v54  ;;  %v684_v58 = vmax.f32 %v646_v51, 0.0 }
 0x1d8   : > { %v687_v57 = vmax.f32 %v657_v53, 0.0 }
 0x1d9   : > { %v685_v59 = vmax.f32 %v649_v55, 0.0 }
 0x1da   : > { %v697_v60 = vpack.c.bf16 %v687_v57, %v686_v56 }
 0x1db   : > { %v696_v61 = vpack.c.bf16 %v685_v59, %v684_v58  ;;  %v1080_v62 = vpop.f32.mrb[12].mxu1 }
 0x1dc   : > { %v670_v63 = vadd.f32 %v1080_v62, %v968_v19  ;;  %v661_v0 = vpop.f32.mrb[13].mxu1 }
 0x1dd   : > { %v662_v1 = vadd.f32 %v968_v19, %v661_v0  ;;  %v1081_v2 = vpop.f32.mrb[14].mxu1  ;;  %1106 = vmatprep.mubr.bf16.mxu0 %v696_v61 }
 0x1de   : > { %v673_v3 = vadd.f32 %v1081_v2, %v968_v19  ;;  %v664_v4 = vpop.f32.mrb[15].mxu1  ;;  %1107 = vmatmul.mubr.bf16.gmra.mrb[24].mxu0 %v697_v60  ;;  %v690_v6 = vmax.f32 %v670_v63, 0.0 }
 0x1df   : > { %v665_v5 = vadd.f32 %v968_v19, %v664_v4  ;;  %v688_v8 = vmax.f32 %v662_v1, 0.0 }
 0x1e0   : > { %v691_v7 = vmax.f32 %v673_v3, 0.0 }
 0x1e1   : > { %v689_v9 = vmax.f32 %v665_v5, 0.0 }
 0x1e2   : > { %v699_v10 = vpack.c.bf16 %v691_v7, %v690_v6 }
 0x1e3   : > { %v698_v11 = vpack.c.bf16 %v689_v9, %v688_v8 }
 0x1e5   : > { %1110 = vmatprep.mubr.bf16.mxu0 %v698_v11 }
 0x1e6   : > { %1111 = vmatmul.mubr.bf16.gmra.mrb[28].mxu0 %v699_v10 }
 0x2a1   : > { %v1100_v13 = vpop.f32.mrb[16].mxu0 }
 0x2a2   : > { %v814_v14 = vadd.f32 %v1100_v13, %v977_v12  ;;  %v805_v15 = vpop.f32.mrb[17].mxu0 }
 0x2a3   : > { %v806_v16 = vadd.f32 %v977_v12, %v805_v15  ;;  %v1101_v17 = vpop.f32.mrb[18].mxu0 }
 0x2a4   : > { %870 = vst [vmem:[%s1295_s11 + $0x10] sm:$0xff] %v814_v14  ;;  %v817_v18 = vadd.f32 %v1101_v17, %v977_v12  ;;  %v808_v19 = vpop.f32.mrb[19].mxu0 }
 0x2a5   : > { %868 = vst [vmem:[%s1295_s11] sm:$0xff] %v806_v16  ;;  %v809_v20 = vadd.f32 %v977_v12, %v808_v19 }
 0x2a6   : > { %871 = vst [vmem:[%s1295_s11 + $0x18] sm:$0xff] %v817_v18 }
 0x2a7   : > { %869 = vst [vmem:[%s1295_s11 + $0x8] sm:$0xff] %v809_v20 }
 0x2a9   : > { %v1104_v21 = vpop.f32.mrb[20].mxu0 }
 0x2aa   : > { %v830_v22 = vadd.f32 %v1104_v21, %v977_v12  ;;  %v821_v23 = vpop.f32.mrb[21].mxu0 }
 0x2ab   : > { %v822_v24 = vadd.f32 %v977_v12, %v821_v23  ;;  %v1105_v25 = vpop.f32.mrb[22].mxu0 }
 0x2ac   : > { %874 = vst [vmem:[%s1295_s11 + $0x30] sm:$0xff] %v830_v22  ;;  %v833_v26 = vadd.f32 %v1105_v25, %v977_v12  ;;  %v824_v27 = vpop.f32.mrb[23].mxu0 }
 0x2ad   : > { %872 = vst [vmem:[%s1295_s11 + $0x20] sm:$0xff] %v822_v24  ;;  %v825_v28 = vadd.f32 %v977_v12, %v824_v27 }
 0x2ae   : > { %875 = vst [vmem:[%s1295_s11 + $0x38] sm:$0xff] %v833_v26 }
 0x2af   : > { %873 = vst [vmem:[%s1295_s11 + $0x28] sm:$0xff] %v825_v28 }
 0x2b1   : > { %v1108_v29 = vpop.f32.mrb[24].mxu0 }
 0x2b2   : > { %v846_v30 = vadd.f32 %v1108_v29, %v977_v12  ;;  %v837_v31 = vpop.f32.mrb[25].mxu0 }
 0x2b3   : > { %v838_v32 = vadd.f32 %v977_v12, %v837_v31  ;;  %v1109_v33 = vpop.f32.mrb[26].mxu0 }
 0x2b4   : > { %878 = vst [vmem:[%s1295_s11 + $0x50] sm:$0xff] %v846_v30  ;;  %v849_v34 = vadd.f32 %v1109_v33, %v977_v12  ;;  %v840_v35 = vpop.f32.mrb[27].mxu0 }
 0x2b5   : > { %876 = vst [vmem:[%s1295_s11 + $0x40] sm:$0xff] %v838_v32  ;;  %v841_v36 = vadd.f32 %v977_v12, %v840_v35 }
 0x2b6   : > { %879 = vst [vmem:[%s1295_s11 + $0x58] sm:$0xff] %v849_v34 }
 0x2b7   : > { %877 = vst [vmem:[%s1295_s11 + $0x48] sm:$0xff] %v841_v36 }
 0x2b9   : > { %v1112_v37 = vpop.f32.mrb[28].mxu0 }
 0x2ba   : > { %v862_v38 = vadd.f32 %v1112_v37, %v977_v12  ;;  %v853_v39 = vpop.f32.mrb[29].mxu0 }
 0x2bb   : > { %v854_v40 = vadd.f32 %v977_v12, %v853_v39  ;;  %v1113_v41 = vpop.f32.mrb[30].mxu0 }
 0x2bc   : > { %882 = vst [vmem:[%s1295_s11 + $0x70] sm:$0xff] %v862_v38  ;;  %v865_v42 = vadd.f32 %v1113_v41, %v977_v12  ;;  %v856_v43 = vpop.f32.mrb[31].mxu0 }
 0x2bd   : > { %880 = vst [vmem:[%s1295_s11 + $0x60] sm:$0xff] %v854_v40  ;;  %v857_v44 = vadd.f32 %v977_v12, %v856_v43 }
 0x2be   : > { %883 = vst [vmem:[%s1295_s11 + $0x78] sm:$0xff] %v865_v42 }
 0x2bf   : > { %881 = vst [vmem:[%s1295_s11 + $0x68] sm:$0xff] %v857_v44 }
 0x2c0 PF: > { %s17_s24 = sadd.s32 1, %s1154_s24  }
 0x2c1   : > { %p14_p4 = scmp.ge.s32.totalorder %s17_s24, 6  }
 0x2c3   :  { %16 = sbr.rel (!%p14_p4) target bundleno = 1 (0x1), region = 78 }

</bundles_post_ra>
